<compile_context>
chip_gen: v5e
topology: v5e:2x2
jax: 0.10.0
libtpu: 0.0.40
codegen_flags: <defaults>
</compile_context>

<pallas_src>
import functools

import jax
import jax.numpy as jnp
from jax.experimental import pallas as pl
from jax.experimental.pallas import tpu as pltpu


def _round_up(n: int, m: int) -> int:
    return (n + m - 1) // m * m


@functools.lru_cache(maxsize=None)
def _vmem_limit_bytes() -> int:
    """Per-generation VMEM budget: ~80% of physical, capped, leaving headroom
    for compiler scratch / DMA buffers (v7x: ~51 of 64 MiB; v5e/v6e: ~102 of 128)."""
    try:
        cap = pltpu.get_tpu_info().vmem_capacity_bytes
    except Exception:
        cap = 128 * 1024 * 1024
    return max(32 * 1024 * 1024, min(int(cap * 0.8), 110 * 1024 * 1024))


def _projector_kernel(x_ref, w1_ref, b1_ref, w2_ref, b2_ref, o_ref):
    # Cast activations to the weight compute dtype on the VPU (free filler under
    # an MXU-bound loop); both matmuls accumulate in f32; bias + ReLU stay f32.
    x = x_ref[...].astype(w1_ref.dtype)
    h = jnp.dot(x, w1_ref[...], preferred_element_type=jnp.float32)
    h = jnp.maximum(h + b1_ref[...], 0.0)                    # (tile_m, H_p) + (1, H_p)
    y = jnp.dot(h.astype(w2_ref.dtype), w2_ref[...],
                preferred_element_type=jnp.float32)
    o_ref[...] = (y + b2_ref[...]).astype(o_ref.dtype)


def prepare_projector_params(w1, b1, w2, b2, compute_dtype=jnp.bfloat16):
    """One-time pad (features -> multiples of 128 lanes) + cast of the weights.

    Weights are stored as (in_features, out_features), i.e. the transpose of
    PyTorch nn.Linear's weight.  Zero padding is exact: padded x-cols hit padded
    W1-rows (0), padded hidden units have 0 weight/bias (ReLU(0)=0) and 0 rows
    in W2; padded output columns are sliced off after the call.
    """
    D_in, H = w1.shape
    H2, D_out = w2.shape
    assert H == H2 and b1.shape == (H,) and b2.shape == (D_out,)
    D_in_p, H_p, D_out_p = (_round_up(d, 128) for d in (D_in, H, D_out))
    w1_p = jnp.pad(w1, ((0, D_in_p - D_in), (0, H_p - H))).astype(compute_dtype)
    w2_p = jnp.pad(w2, ((0, H_p - H), (0, D_out_p - D_out))).astype(compute_dtype)
    b1_p = jnp.pad(b1, (0, H_p - H)).reshape(1, H_p).astype(jnp.float32)
    b2_p = jnp.pad(b2, (0, D_out_p - D_out)).reshape(1, D_out_p).astype(jnp.float32)
    return w1_p, b1_p, w2_p, b2_p


@functools.partial(jax.jit, static_argnames=("d_out", "tile_m", "out_dtype"))
def projector_forward(x, w1_p, b1_p, w2_p, b2_p, *, d_out, tile_m=512,
                      out_dtype=None):
    """x: (B, T, D_in) -> (B, T, d_out) using pre-padded/pre-cast params."""
    B, T, D_in = x.shape
    M = B * T
    D_in_p, H_p = w1_p.shape
    _, D_out_p = w2_p.shape
    out_dtype = x.dtype if out_dtype is None else out_dtype

    x2d = x.reshape(M, D_in)
    if D_in_p != D_in:                        # lane pad only when misaligned
        x2d = jnp.pad(x2d, ((0, 0), (0, D_in_p - D_in)))

    grid = (pl.cdiv(M, tile_m),)              # ragged last row-block handled by Pallas

    nbytes = lambda a: a.size * a.dtype.itemsize
    cost = pl.CostEstimate(
        flops=2 * M * (D_in_p * H_p + H_p * D_out_p),
        transcendentals=0,
        bytes_accessed=(nbytes(x2d) + nbytes(w1_p) + nbytes(w2_p)
                        + nbytes(b1_p) + nbytes(b2_p)
                        + M * D_out_p * jnp.dtype(out_dtype).itemsize),
    )

    # Resident operands (constant index_map) are single-buffered: re-fetch never
    # happens, so double-buffering them is pure VMEM waste.
    resident = dict(pipeline_mode=pl.Buffered(1))
    # TODO(synk): for projectors whose padded bf16 W1+W2 exceed ~40-48 MiB on v7x,
    # add a second grid axis that streams W2 column blocks instead of keeping both
    # weight matrices fully resident.
    out2d = pl.pallas_call(
        _projector_kernel,
        out_shape=jax.ShapeDtypeStruct((M, D_out_p), out_dtype),
        grid_spec=pltpu.PrefetchScalarGridSpec(
            num_scalar_prefetch=0,
            grid=grid,
            in_specs=[
                pl.BlockSpec((tile_m, D_in_p), lambda i: (i, 0)),            # x tile
                pl.BlockSpec((D_in_p, H_p), lambda i: (0, 0), **resident),   # W1
                pl.BlockSpec((1, H_p), lambda i: (0, 0), **resident),        # b1 (f32)
                pl.BlockSpec((H_p, D_out_p), lambda i: (0, 0), **resident),  # W2
                pl.BlockSpec((1, D_out_p), lambda i: (0, 0), **resident),    # b2 (f32)
            ],
            out_specs=pl.BlockSpec((tile_m, D_out_p), lambda i: (i, 0)),
        ),
        compiler_params=pltpu.CompilerParams(
            dimension_semantics=("parallel",),       # shard row tiles across TCs (v7x)
            vmem_limit_bytes=_vmem_limit_bytes(),
        ),
        cost_estimate=cost,
    )(x2d, w1_p, b1_p, w2_p, b2_p)

    # Slice off output-feature padding (no-op when d_out % 128 == 0).
    return out2d[:, :d_out].reshape(B, T, d_out)


def init_projector_params(key, input_dim, hidden_dim, output_dim,
                          dtype=jnp.float32):
    """Deterministic init mimicking nn.Linear's U(-1/sqrt(fan_in), 1/sqrt(fan_in)).
    Weights are stored transposed vs PyTorch: (in_features, out_features)."""
    k1, k2, k3, k4 = jax.random.split(key, 4)
    lim1 = 1.0 / jnp.sqrt(input_dim)
    lim2 = 1.0 / jnp.sqrt(hidden_dim)
    w1 = jax.random.uniform(k1, (input_dim, hidden_dim), dtype, -lim1, lim1)
    b1 = jax.random.uniform(k2, (hidden_dim,), dtype, -lim1, lim1)
    w2 = jax.random.uniform(k3, (hidden_dim, output_dim), dtype, -lim2, lim2)
    b2 = jax.random.uniform(k4, (output_dim,), dtype, -lim2, lim2)
    return w1, b1, w2, b2


if __name__ == "__main__":
    # Small demo shapes consistent with the module's forward: x of (B, T, D_in).
    B, T = 2, 8
    input_dim, hidden_dim, output_dim = 32, 64, 48

    key = jax.random.PRNGKey(0)
    kx, kp = jax.random.split(key)
    x = jax.random.normal(kx, (B, T, input_dim), dtype=jnp.float32)
    w1, b1, w2, b2 = init_projector_params(kp, input_dim, hidden_dim, output_dim)

    # One-time pad + bf16 cast of the weights (hoisted out of the per-call path).
    params_bf16 = prepare_projector_params(w1, b1, w2, b2)

    out = projector_forward(x, *params_bf16, d_out=output_dim)   # bf16 MXU, f32 accum
    out = jax.block_until_ready(out)
    assert out.shape == (B, T, output_dim)

    # Reference 1: same bf16-input / f32-accumulation math in plain JAX.
    x2d = x.reshape(B * T, input_dim)
    h_ref = jnp.maximum(
        jnp.dot(x2d.astype(jnp.bfloat16), w1.astype(jnp.bfloat16),
                preferred_element_type=jnp.float32) + b1, 0.0)
    ref_bf16 = (jnp.dot(h_ref.astype(jnp.bfloat16), w2.astype(jnp.bfloat16),
                        preferred_element_type=jnp.float32) + b2
                ).reshape(B, T, output_dim)
    assert jnp.allclose(out, ref_bf16, atol=1e-3, rtol=1e-3)

    # Reference 2: full-precision PyTorch-equivalent math (loose tolerance for
    # the bf16 matmul inputs).
    ref_f32 = (jnp.maximum(x2d @ w1 + b1, 0.0) @ w2 + b2).reshape(B, T, output_dim)
    assert jnp.allclose(out, ref_f32, atol=5e-2, rtol=5e-2)

    # bf16 output path (halves output DMA / out double-buffer for downstream LLM).
    out_bf16 = jax.block_until_ready(
        projector_forward(x, *params_bf16, d_out=output_dim, out_dtype=jnp.bfloat16))
    assert out_bf16.dtype == jnp.bfloat16 and out_bf16.shape == (B, T, output_dim)
    assert jnp.allclose(out_bf16.astype(jnp.float32), ref_bf16, atol=3e-2, rtol=3e-2)

    # Pure-f32 compute path once (exact vs the f32 reference; debugging aid).
    params_f32 = prepare_projector_params(w1, b1, w2, b2, compute_dtype=jnp.float32)
    out_f32 = jax.block_until_ready(
        projector_forward(x, *params_f32, d_out=output_dim))
    assert jnp.allclose(out_f32, ref_f32, atol=1e-5, rtol=1e-5)

    print("KERNEL_OK")
</pallas_src>

<mosaic_0001>
module attributes {stable_mosaic.version = 11 : i64} {
  func.func @_projector_kernel(%arg0: i32, %arg1: memref<512x128xf32, #tpu.memory_space<vmem>>, %arg2: memref<128x128xbf16, #tpu.memory_space<vmem>>, %arg3: memref<1x128xf32, #tpu.memory_space<vmem>>, %arg4: memref<128x128xbf16, #tpu.memory_space<vmem>>, %arg5: memref<1x128xf32, #tpu.memory_space<vmem>>, %arg6: memref<512x128xf32, #tpu.memory_space<vmem>>) attributes {dimension_semantics = [#tpu.dimension_semantics<parallel>], iteration_bounds = array<i64: 1>, scalar_prefetch = 0 : i64, scratch_operands = 0 : i64, tpu.core_type = #tpu.core_type<tc>, window_params = [{transform_indices = @transform_0, window_bounds = array<i64: 512, 128>}, {pipeline_mode = #tpu.pipeline_mode<synchronous>, transform_indices = @transform_1, window_bounds = array<i64: 128, 128>}, {pipeline_mode = #tpu.pipeline_mode<synchronous>, transform_indices = @transform_2, window_bounds = array<i64: 1, 128>}, {pipeline_mode = #tpu.pipeline_mode<synchronous>, transform_indices = @transform_3, window_bounds = array<i64: 128, 128>}, {pipeline_mode = #tpu.pipeline_mode<synchronous>, transform_indices = @transform_4, window_bounds = array<i64: 1, 128>}, {transform_indices = @transform_5, window_bounds = array<i64: 512, 128>}]} {
    %c0 = arith.constant 0 : index
    %c0_0 = arith.constant 0 : index
    %0 = vector.load %arg1[%c0, %c0_0] : memref<512x128xf32, #tpu.memory_space<vmem>>, vector<512x128xf32>
    %1 = arith.truncf %0 : vector<512x128xf32> to vector<512x128xbf16>
    %c0_1 = arith.constant 0 : index
    %c0_2 = arith.constant 0 : index
    %2 = vector.load %arg2[%c0_1, %c0_2] : memref<128x128xbf16, #tpu.memory_space<vmem>>, vector<128x128xbf16>
    %cst = arith.constant dense<0.000000e+00> : vector<512x128xf32>
    %3 = tpu.matmul %1, %2, %cst {dimension_numbers = #tpu.dot_dimension_numbers<[1], [0], [0], [1], [0, 0, 1, 1], [], []>} : vector<512x128xbf16>, vector<128x128xbf16>, vector<512x128xf32> -> vector<512x128xf32>
    %c0_3 = arith.constant 0 : index
    %c0_4 = arith.constant 0 : index
    %4 = vector.load %arg3[%c0_3, %c0_4] : memref<1x128xf32, #tpu.memory_space<vmem>>, vector<1x128xf32>
    %5 = vector.broadcast %4 : vector<1x128xf32> to vector<512x128xf32>
    %6 = arith.addf %3, %5 : vector<512x128xf32>
    %cst_5 = arith.constant 0.000000e+00 : f32
    %7 = vector.broadcast %cst_5 : f32 to vector<512x128xf32>
    %8 = arith.maximumf %6, %7 : vector<512x128xf32>
    %9 = arith.truncf %8 : vector<512x128xf32> to vector<512x128xbf16>
    %c0_6 = arith.constant 0 : index
    %c0_7 = arith.constant 0 : index
    %10 = vector.load %arg4[%c0_6, %c0_7] : memref<128x128xbf16, #tpu.memory_space<vmem>>, vector<128x128xbf16>
    %cst_8 = arith.constant dense<0.000000e+00> : vector<512x128xf32>
    %11 = tpu.matmul %9, %10, %cst_8 {dimension_numbers = #tpu.dot_dimension_numbers<[1], [0], [0], [1], [0, 0, 1, 1], [], []>} : vector<512x128xbf16>, vector<128x128xbf16>, vector<512x128xf32> -> vector<512x128xf32>
    %c0_9 = arith.constant 0 : index
    %c0_10 = arith.constant 0 : index
    %12 = vector.load %arg5[%c0_9, %c0_10] : memref<1x128xf32, #tpu.memory_space<vmem>>, vector<1x128xf32>
    %13 = vector.broadcast %12 : vector<1x128xf32> to vector<512x128xf32>
    %14 = arith.addf %11, %13 : vector<512x128xf32>
    %c0_11 = arith.constant 0 : index
    %c0_12 = arith.constant 0 : index
    %15 = vector.load %arg6[%c0_11, %c0_12] : memref<512x128xf32, #tpu.memory_space<vmem>>, vector<512x128xf32>
    tpu.vector_store %arg6[%c0_11, %c0_12], %14 {strides = array<i32>} : memref<512x128xf32, #tpu.memory_space<vmem>>, vector<512x128xf32>,
    return
  }
  func.func @transform_0(%arg0: i32) -> (i32, i32) {
    %c0_i32 = arith.constant 0 : i32
    %c0_i32_0 = arith.constant 0 : i32
    return %arg0, %c0_i32 : i32, i32
  }
  func.func @transform_1(%arg0: i32) -> (i32, i32) {
    %c0_i32 = arith.constant 0 : i32
    %c0_i32_0 = arith.constant 0 : i32
    %c0_i32_1 = arith.constant 0 : i32
    return %c0_i32, %c0_i32_0 : i32, i32
  }
  func.func @transform_2(%arg0: i32) -> (i32, i32) {
    %c0_i32 = arith.constant 0 : i32
    %c0_i32_0 = arith.constant 0 : i32
    %c0_i32_1 = arith.constant 0 : i32
    return %c0_i32, %c0_i32_0 : i32, i32
  }
  func.func @transform_3(%arg0: i32) -> (i32, i32) {
    %c0_i32 = arith.constant 0 : i32
    %c0_i32_0 = arith.constant 0 : i32
    %c0_i32_1 = arith.constant 0 : i32
    return %c0_i32, %c0_i32_0 : i32, i32
  }
  func.func @transform_4(%arg0: i32) -> (i32, i32) {
    %c0_i32 = arith.constant 0 : i32
    %c0_i32_0 = arith.constant 0 : i32
    %c0_i32_1 = arith.constant 0 : i32
    return %c0_i32, %c0_i32_0 : i32, i32
  }
  func.func @transform_5(%arg0: i32) -> (i32, i32) {
    %c0_i32 = arith.constant 0 : i32
    %c0_i32_0 = arith.constant 0 : i32
    return %arg0, %c0_i32 : i32, i32
  }
}

</mosaic_0001>

<bundles_post_ra>
// kernel: projector_forward.1
= control target key start
LH: loop header
LB: loop body
LE: loop exit
PB: predicated region body
PF: predicated region fallthrough
CT: control target
= control target key end

     0   :  { %10 = vsyncpa [#allocation3], 0  ;;  %s1293_s0 = inlined_call_operand.vmem [shape: f32[16,128], index: 0, kind: input, shape index: {}]   ;;  %s1294_s1 = inlined_call_operand.hbm [shape: bf16[128,128], index: 1, kind: input, shape index: {}]   ;;  %s1295_s2 = inlined_call_operand.vmem [shape: f32[1,128], index: 2, kind: input, shape index: {}]   ;;  %s1296_s3 = inlined_call_operand.hbm [shape: bf16[128,128], index: 3, kind: input, shape index: {}]   ;;  %s1297_s4 = inlined_call_operand.vmem [shape: f32[1,128], index: 4, kind: input, shape index: {}]   ;;  %s1298_s5 = inlined_call_operand.vmem [shape: f32[16,128], index: 5, kind: output, shape index: {}]  }
   0x1   :  { %s18_s20 = sshll.u32 %s1294_s1, 4  ;;  %s19_s20 = int_to_ptr.hbm [resolvable:$true] %s18_s20 }
   0x2   :  { %11 = vsyncpa [#allocation5], 0  ;;  %s983_s21 = smov [#allocation2]   ;;  %s33_s25 = sshll.u32 %s1296_s3, 4  ;;  %s34_s25 = int_to_ptr.hbm [resolvable:$true] %s33_s25 }
   0x3   :  { %s20_s22 = sshll.u32 %s983_s21, 4  ;;  %s984_s26 = smov 64   ;;  %s21_s22 = int_to_ptr.vmem [resolvable:$true] %s20_s22 }
   0x4   :  { %s985_s27 = smov 4   ;;  %s986_s28 = smov [#allocation4]  }
   0x5   :  { %26 = dma.hbm_to_vmem [thread:$0]  %s19_s20, 1024, %s21_s22, [#allocation3], %s984_s26, %s984_s26, %s985_s27  }
   0x6   :  { %s35_s29 = sshll.u32 %s986_s28, 4  ;;  %s36_s29 = int_to_ptr.vmem [resolvable:$true] %s35_s29 }
   0x7   :  { %41 = dma.hbm_to_vmem [thread:$0]  %s34_s25, 1024, %s36_s29, [#allocation5], %s984_s26, %s984_s26, %s985_s27  }
   0x8   :  { %979 = dma.done.wait [#allocation3], 1024  }
   0x9   :  { %980 = vsyncadd [#allocation3], 4294966272 }
   0xa   :  { %981 = dma.done.wait [#allocation5], 1024  }
   0xb   :  { %982 = vsyncadd [#allocation5], 4294966272  ;;  %v900_v0 = vld [vmem:[#allocation2 + $0x38] sm:$0xff]  ;;  %v899_v1 = vld [vmem:[#allocation2 + $0x30] sm:$0xff] }
   0xc   :  { %216 = vmatpush.bf16.msra.mxu0 %v900_v0  ;;  %909 = vmatpush.bf16.msra.mxu2 %v900_v0  ;;  %v898_v2 = vld [vmem:[#allocation2 + $0x28] sm:$0xff]  ;;  %v897_v3 = vld [vmem:[#allocation2 + $0x20] sm:$0xff]  ;;  %v896_v4 = vld [vmem:[#allocation2 + $0x18] sm:$0xff] }
   0xd   :  { %v895_v5 = vld [vmem:[#allocation2 + $0x10] sm:$0xff]  ;;  %v894_v6 = vld [vmem:[#allocation2 + $0x8] sm:$0xff]  ;;  %v893_v7 = vld [vmem:[#allocation2] sm:$0xff] }
   0xe   :  { %v52_v8 = vld [vmem:[%s1293_s0] sm:$0xff]  ;;  %v53_v9 = vld [vmem:[%s1293_s0 + $0x8] sm:$0xff]  ;;  %v54_v14 = vld [vmem:[%s1293_s0 + $0x10] sm:$0xff] }
   0xf   :  { %v84_v10 = vld [vmem:[%s1293_s0 + $0x100] sm:$0xff]  ;;  %v85_v11 = vld [vmem:[%s1293_s0 + $0x108] sm:$0xff]  ;;  %v116_v12 = vpack.c.bf16 %v53_v9, %v52_v8  ;;  %v55_v15 = vld [vmem:[%s1293_s0 + $0x18] sm:$0xff] }
  0x10   :  { %217 = vmatpush.bf16.msra.mxu0 %v899_v1  ;;  %910 = vmatpush.bf16.msra.mxu2 %v899_v1  ;;  %v132_v13 = vpack.c.bf16 %v85_v11, %v84_v10  ;;  %v86_v16 = vld [vmem:[%s1293_s0 + $0x110] sm:$0xff]  ;;  %v87_v17 = vld [vmem:[%s1293_s0 + $0x118] sm:$0xff]  ;;  %v117_v18 = vpack.c.bf16 %v55_v15, %v54_v14  ;;  %v56_v20 = vld [vmem:[%s1293_s0 + $0x20] sm:$0xff] }
  0x11   :  { %v133_v19 = vpack.c.bf16 %v87_v17, %v86_v16  ;;  %v57_v21 = vld [vmem:[%s1293_s0 + $0x28] sm:$0xff]  ;;  %v88_v22 = vld [vmem:[%s1293_s0 + $0x120] sm:$0xff]  ;;  %v58_v26 = vld [vmem:[%s1293_s0 + $0x30] sm:$0xff] }
  0x12   :  { %v89_v23 = vld [vmem:[%s1293_s0 + $0x128] sm:$0xff]  ;;  %v118_v24 = vpack.c.bf16 %v57_v21, %v56_v20  ;;  %v59_v27 = vld [vmem:[%s1293_s0 + $0x38] sm:$0xff]  ;;  %v90_v28 = vld [vmem:[%s1293_s0 + $0x130] sm:$0xff] }
  0x13   :  { %v134_v25 = vpack.c.bf16 %v89_v23, %v88_v22  ;;  %v91_v29 = vld [vmem:[%s1293_s0 + $0x138] sm:$0xff]  ;;  %v119_v30 = vpack.c.bf16 %v59_v27, %v58_v26  ;;  %v60_v32 = vld [vmem:[%s1293_s0 + $0x40] sm:$0xff]  ;;  %v61_v33 = vld [vmem:[%s1293_s0 + $0x48] sm:$0xff] }
  0x14   :  { %218 = vmatpush.bf16.msra.mxu0 %v898_v2  ;;  %911 = vmatpush.bf16.msra.mxu2 %v898_v2  ;;  %v135_v31 = vpack.c.bf16 %v91_v29, %v90_v28  ;;  %v92_v34 = vld [vmem:[%s1293_s0 + $0x140] sm:$0xff]  ;;  %v93_v35 = vld [vmem:[%s1293_s0 + $0x148] sm:$0xff]  ;;  %v120_v36 = vpack.c.bf16 %v61_v33, %v60_v32  ;;  %v908_v38 = vld [vmem:[#allocation4 + $0x38] sm:$0xff] }
  0x15   :  { %v136_v37 = vpack.c.bf16 %v93_v35, %v92_v34  ;;  %549 = vmatpush.bf16.msra.mxu1 %v908_v38  ;;  %917 = vmatpush.bf16.msra.mxu3 %v908_v38  ;;  %v62_v39 = vld [vmem:[%s1293_s0 + $0x50] sm:$0xff]  ;;  %v63_v40 = vld [vmem:[%s1293_s0 + $0x58] sm:$0xff]  ;;  %v906_v46 = vld [vmem:[#allocation4 + $0x28] sm:$0xff] }
  0x16   :  { %v94_v41 = vld [vmem:[%s1293_s0 + $0x150] sm:$0xff]  ;;  %v95_v42 = vld [vmem:[%s1293_s0 + $0x158] sm:$0xff]  ;;  %v121_v43 = vpack.c.bf16 %v63_v40, %v62_v39  ;;  %v905_v47 = vld [vmem:[#allocation4 + $0x20] sm:$0xff] }
  0x17   :  { %v137_v44 = vpack.c.bf16 %v95_v42, %v94_v41  ;;  %v907_v45 = vld [vmem:[#allocation4 + $0x30] sm:$0xff]  ;;  %v64_v48 = vld [vmem:[%s1293_s0 + $0x60] sm:$0xff]  ;;  %v65_v49 = vld [vmem:[%s1293_s0 + $0x68] sm:$0xff] }
  0x18   :  { %219 = vmatpush.bf16.msra.mxu0 %v897_v3  ;;  %912 = vmatpush.bf16.msra.mxu2 %v897_v3  ;;  %v96_v50 = vld [vmem:[%s1293_s0 + $0x160] sm:$0xff]  ;;  %v97_v51 = vld [vmem:[%s1293_s0 + $0x168] sm:$0xff]  ;;  %v904_v52 = vld [vmem:[#allocation4 + $0x18] sm:$0xff]  ;;  %v122_v53 = vpack.c.bf16 %v65_v49, %v64_v48 }
  0x19   :  { %550 = vmatpush.bf16.msra.mxu1 %v907_v45  ;;  %918 = vmatpush.bf16.msra.mxu3 %v907_v45  ;;  %v138_v54 = vpack.c.bf16 %v97_v51, %v96_v50  ;;  %v903_v55 = vld [vmem:[#allocation4 + $0x10] sm:$0xff]  ;;  %v902_v56 = vld [vmem:[#allocation4 + $0x8] sm:$0xff]  ;;  %v901_v57 = vld [vmem:[#allocation4] sm:$0xff] }
  0x1a   :  { %v66_v58 = vld [vmem:[%s1293_s0 + $0x70] sm:$0xff]  ;;  %v67_v59 = vld [vmem:[%s1293_s0 + $0x78] sm:$0xff]  ;;  %v68_v0 = vld [vmem:[%s1293_s0 + $0x80] sm:$0xff] }
  0x1b   :  { %v98_v60 = vld [vmem:[%s1293_s0 + $0x170] sm:$0xff]  ;;  %v99_v61 = vld [vmem:[%s1293_s0 + $0x178] sm:$0xff]  ;;  %v123_v62 = vpack.c.bf16 %v67_v59, %v66_v58  ;;  %v69_v1 = vld [vmem:[%s1293_s0 + $0x88] sm:$0xff] }
  0x1c   :  { %220 = vmatpush.bf16.msra.mxu0 %v896_v4  ;;  %913 = vmatpush.bf16.msra.mxu2 %v896_v4  ;;  %v139_v63 = vpack.c.bf16 %v99_v61, %v98_v60  ;;  %v100_v2 = vld [vmem:[%s1293_s0 + $0x180] sm:$0xff]  ;;  %v101_v3 = vld [vmem:[%s1293_s0 + $0x188] sm:$0xff]  ;;  %v124_v4 = vpack.c.bf16 %v69_v1, %v68_v0  ;;  %v70_v14 = vld [vmem:[%s1293_s0 + $0x90] sm:$0xff] }
  0x1d   :  { %551 = vmatpush.bf16.msra.mxu1 %v906_v46  ;;  %919 = vmatpush.bf16.msra.mxu3 %v906_v46  ;;  %v71_v15 = vld [vmem:[%s1293_s0 + $0x98] sm:$0xff]  ;;  %v102_v16 = vld [vmem:[%s1293_s0 + $0x190] sm:$0xff]  ;;  %v72_v34 = vld [vmem:[%s1293_s0 + $0xa0] sm:$0xff] }
  0x1e   :  { %v103_v17 = vld [vmem:[%s1293_s0 + $0x198] sm:$0xff]  ;;  %v125_v22 = vpack.c.bf16 %v71_v15, %v70_v14  ;;  %v73_v35 = vld [vmem:[%s1293_s0 + $0xa8] sm:$0xff] }
  0x1f   :  { %v141_v23 = vpack.c.bf16 %v103_v17, %v102_v16  ;;  %v126_v42 = vpack.c.bf16 %v73_v35, %v72_v34  ;;  %v109_v14 = vld [vmem:[%s1293_s0 + $0x1c8] sm:$0xff]  ;;  %v111_v34 = vld [vmem:[%s1293_s0 + $0x1d8] sm:$0xff] }
  0x20   :  { %221 = vmatpush.bf16.msra.mxu0 %v895_v5  ;;  %914 = vmatpush.bf16.msra.mxu2 %v895_v5  ;;  %v140_v5 = vpack.c.bf16 %v101_v3, %v100_v2 }
  0x21   :  { %552 = vmatpush.bf16.msra.mxu1 %v905_v47  ;;  %920 = vmatpush.bf16.msra.mxu3 %v905_v47 }
  0x24   :  { %222 = vmatpush.bf16.msra.mxu0 %v894_v6  ;;  %915 = vmatpush.bf16.msra.mxu2 %v894_v6 }
  0x25   :  { %553 = vmatpush.bf16.msra.mxu1 %v904_v52  ;;  %921 = vmatpush.bf16.msra.mxu3 %v904_v52 }
  0x28   :  { %223 = vmatpush.bf16.msra.mxu0 %v893_v7  ;;  %916 = vmatpush.bf16.msra.mxu2 %v893_v7  ;;  %v1134_v7 = vld [vmem:[%s1295_s2] ss:$0 sm:$0xff] }
  0x29   :  { %554 = vmatpush.bf16.msra.mxu1 %v903_v55  ;;  %922 = vmatpush.bf16.msra.mxu3 %v903_v55  ;;  %v75_v55 = vld [vmem:[%s1293_s0 + $0xb8] sm:$0xff] }
  0x2b   :  { %224 = vmatmul.bf16.vlgmr.msra.gmra.mxu0 %v116_v12  ;;  %304 = vmatmul.bf16.vlgmr.msra.gmra.mxu2 %v132_v13 }
  0x2d   :  { %555 = vmatpush.bf16.msra.mxu1 %v902_v56  ;;  %923 = vmatpush.bf16.msra.mxu3 %v902_v56  ;;  %v106_v56 = vld [vmem:[%s1293_s0 + $0x1b0] sm:$0xff] }
  0x31   :  { %556 = vmatpush.bf16.msra.mxu1 %v901_v57  ;;  %924 = vmatpush.bf16.msra.mxu3 %v901_v57  ;;  %v107_v57 = vld [vmem:[%s1293_s0 + $0x1b8] sm:$0xff] }
  0x3b   :  { %229 = vmatmul.bf16.gmra.mxu0 %v117_v18  ;;  %309 = vmatmul.bf16.gmra.mxu2 %v133_v19 }
  0x4b   :  { %234 = vmatmul.bf16.gmra.mxu0 %v118_v24  ;;  %314 = vmatmul.bf16.gmra.mxu2 %v134_v25 }
  0x5b   :  { %239 = vmatmul.bf16.gmra.mxu0 %v119_v30  ;;  %319 = vmatmul.bf16.gmra.mxu2 %v135_v31 }
  0x6b   :  { %244 = vmatmul.bf16.gmra.mxu0 %v120_v36  ;;  %324 = vmatmul.bf16.gmra.mxu2 %v136_v37  ;;  %v104_v36 = vld [vmem:[%s1293_s0 + $0x1a0] sm:$0xff]  ;;  %v105_v37 = vld [vmem:[%s1293_s0 + $0x1a8] sm:$0xff] }
  0x7b   :  { %249 = vmatmul.bf16.gmra.mxu0 %v121_v43  ;;  %329 = vmatmul.bf16.gmra.mxu2 %v137_v44  ;;  %v142_v43 = vpack.c.bf16 %v105_v37, %v104_v36 }
  0x8b   :  { %254 = vmatmul.bf16.gmra.mxu0 %v122_v53  ;;  %334 = vmatmul.bf16.gmra.mxu2 %v138_v54  ;;  %v74_v54 = vld [vmem:[%s1293_s0 + $0xb0] sm:$0xff] }
  0x9b   :  { %259 = vmatmul.bf16.gmra.mxu0 %v123_v62  ;;  %339 = vmatmul.bf16.gmra.mxu2 %v139_v63  ;;  %v127_v62 = vpack.c.bf16 %v75_v55, %v74_v54  ;;  %v143_v63 = vpack.c.bf16 %v107_v57, %v106_v56  ;;  %v113_v54 = vld [vmem:[%s1293_s0 + $0x1e8] sm:$0xff] }
  0xa8   :  { %v225_v6 = vpop.f32.mrf.mxu0 }
  0xa9   :  { %v226_v8 = vadd.f32 %v1134_v7, %v225_v6 }
  0xab   :  { %264 = vmatmul.bf16.gmra.mxu0 %v124_v4  ;;  %344 = vmatmul.bf16.gmra.mxu2 %v140_v5  ;;  %v385_v11 = vmax.f32 %v226_v8, 0.0 }
  0xae   :  { %v305_v9 = vpop.f32.mrf.mxu2 }
  0xaf   :  { %v306_v18 = vadd.f32 %v1134_v7, %v305_v9 }
  0xb0   :  { %v227_v10 = vpop.f32.mrf.mxu0 }
  0xb1   :  { %v228_v12 = vadd.f32 %v1134_v7, %v227_v10  ;;  %v417_v25 = vmax.f32 %v306_v18, 0.0 }
  0xb3   :  { %v386_v13 = vmax.f32 %v228_v12, 0.0  ;;  %v77_v12 = vld [vmem:[%s1293_s0 + $0xc8] sm:$0xff] }
  0xb5   :  { %v449_v19 = vpack.c.bf16 %v386_v13, %v385_v11  ;;  %v76_v11 = vld [vmem:[%s1293_s0 + $0xc0] sm:$0xff] }
  0xb6   :  { %v307_v20 = vpop.f32.mrf.mxu2  ;;  %v108_v13 = vld [vmem:[%s1293_s0 + $0x1c0] sm:$0xff] }
  0xb7   :  { %v308_v21 = vadd.f32 %v1134_v7, %v307_v20  ;;  %557 = vmatmul.bf16.vlgmr.msra.gmra.mxu1 %v449_v19  ;;  %v128_v19 = vpack.c.bf16 %v77_v12, %v76_v11  ;;  %v144_v20 = vpack.c.bf16 %v109_v14, %v108_v13  ;;  %v115_v11 = vld [vmem:[%s1293_s0 + $0x1f8] sm:$0xff] }
  0xb8   :  { %v230_v24 = vpop.f32.mrf.mxu0 }
  0xb9   :  { %v418_v26 = vmax.f32 %v308_v21, 0.0  ;;  %v231_v28 = vadd.f32 %v1134_v7, %v230_v24 }
  0xbb   :  { %269 = vmatmul.bf16.gmra.mxu0 %v125_v22  ;;  %349 = vmatmul.bf16.gmra.mxu2 %v141_v23  ;;  %v465_v27 = vpack.c.bf16 %v418_v26, %v417_v25  ;;  %v387_v31 = vmax.f32 %v231_v28, 0.0 }
  0xbd   :  { %637 = vmatmul.bf16.vlgmr.msra.gmra.mxu3 %v465_v27 }
  0xbe   :  { %v310_v29 = vpop.f32.mrf.mxu2 }
  0xbf   :  { %v311_v38 = vadd.f32 %v1134_v7, %v310_v29 }
  0xc0   :  { %v232_v30 = vpop.f32.mrf.mxu0 }
  0xc1   :  { %v233_v32 = vadd.f32 %v1134_v7, %v232_v30  ;;  %v419_v45 = vmax.f32 %v311_v38, 0.0 }
  0xc3   :  { %v388_v33 = vmax.f32 %v233_v32, 0.0  ;;  %v79_v32 = vld [vmem:[%s1293_s0 + $0xd8] sm:$0xff] }
  0xc5   :  { %v450_v39 = vpack.c.bf16 %v388_v33, %v387_v31  ;;  %v78_v31 = vld [vmem:[%s1293_s0 + $0xd0] sm:$0xff] }
  0xc6   :  { %v312_v40 = vpop.f32.mrf.mxu2  ;;  %v110_v33 = vld [vmem:[%s1293_s0 + $0x1d0] sm:$0xff] }
  0xc7   :  { %v313_v41 = vadd.f32 %v1134_v7, %v312_v40  ;;  %562 = vmatmul.bf16.gmra.mxu1 %v450_v39  ;;  %v129_v39 = vpack.c.bf16 %v79_v32, %v78_v31  ;;  %v145_v40 = vpack.c.bf16 %v111_v34, %v110_v33 }
  0xc8   :  { %v235_v44 = vpop.f32.mrf.mxu0 }
  0xc9   :  { %v420_v46 = vmax.f32 %v313_v41, 0.0  ;;  %v236_v48 = vadd.f32 %v1134_v7, %v235_v44 }
  0xcb   :  { %274 = vmatmul.bf16.gmra.mxu0 %v126_v42  ;;  %354 = vmatmul.bf16.gmra.mxu2 %v142_v43  ;;  %v466_v47 = vpack.c.bf16 %v420_v46, %v419_v45  ;;  %v389_v51 = vmax.f32 %v236_v48, 0.0 }
  0xcd   :  { %642 = vmatmul.bf16.gmra.mxu3 %v466_v47 }
  0xce   :  { %v315_v49 = vpop.f32.mrf.mxu2 }
  0xcf   :  { %v316_v58 = vadd.f32 %v1134_v7, %v315_v49 }
  0xd0   :  { %v237_v50 = vpop.f32.mrf.mxu0 }
  0xd1   :  { %v238_v52 = vadd.f32 %v1134_v7, %v237_v50  ;;  %v421_v1 = vmax.f32 %v316_v58, 0.0 }
  0xd3   :  { %v390_v53 = vmax.f32 %v238_v52, 0.0  ;;  %v81_v52 = vld [vmem:[%s1293_s0 + $0xe8] sm:$0xff] }
  0xd5   :  { %v451_v59 = vpack.c.bf16 %v390_v53, %v389_v51  ;;  %v80_v51 = vld [vmem:[%s1293_s0 + $0xe0] sm:$0xff] }
  0xd6   :  { %v317_v60 = vpop.f32.mrf.mxu2  ;;  %v112_v53 = vld [vmem:[%s1293_s0 + $0x1e0] sm:$0xff] }
  0xd7   :  { %v318_v61 = vadd.f32 %v1134_v7, %v317_v60  ;;  %567 = vmatmul.bf16.gmra.mxu1 %v451_v59  ;;  %v130_v59 = vpack.c.bf16 %v81_v52, %v80_v51  ;;  %v146_v60 = vpack.c.bf16 %v113_v54, %v112_v53 }
  0xd8   :  { %v240_v0 = vpop.f32.mrf.mxu0 }
  0xd9   :  { %v422_v2 = vmax.f32 %v318_v61, 0.0  ;;  %v241_v4 = vadd.f32 %v1134_v7, %v240_v0 }
  0xdb   :  { %279 = vmatmul.bf16.gmra.mxu0 %v127_v62  ;;  %359 = vmatmul.bf16.gmra.mxu2 %v143_v63  ;;  %v467_v3 = vpack.c.bf16 %v422_v2, %v421_v1  ;;  %v391_v8 = vmax.f32 %v241_v4, 0.0 }
  0xdd   :  { %647 = vmatmul.bf16.gmra.mxu3 %v467_v3 }
  0xde   :  { %v320_v5 = vpop.f32.mrf.mxu2 }
  0xdf   :  { %v321_v15 = vadd.f32 %v1134_v7, %v320_v5 }
  0xe0   :  { %v242_v6 = vpop.f32.mrf.mxu0 }
  0xe1   :  { %v243_v9 = vadd.f32 %v1134_v7, %v242_v6  ;;  %v423_v22 = vmax.f32 %v321_v15, 0.0 }
  0xe3   :  { %v392_v10 = vmax.f32 %v243_v9, 0.0  ;;  %v83_v9 = vld [vmem:[%s1293_s0 + $0xf8] sm:$0xff] }
  0xe5   :  { %v452_v16 = vpack.c.bf16 %v392_v10, %v391_v8  ;;  %v82_v8 = vld [vmem:[%s1293_s0 + $0xf0] sm:$0xff] }
  0xe6   :  { %v322_v17 = vpop.f32.mrf.mxu2  ;;  %v114_v10 = vld [vmem:[%s1293_s0 + $0x1f0] sm:$0xff] }
  0xe7   :  { %v323_v18 = vadd.f32 %v1134_v7, %v322_v17  ;;  %572 = vmatmul.bf16.gmra.mxu1 %v452_v16  ;;  %v131_v16 = vpack.c.bf16 %v83_v9, %v82_v8  ;;  %v147_v17 = vpack.c.bf16 %v115_v11, %v114_v10 }
  0xe8   :  { %v245_v21 = vpop.f32.mrf.mxu0 }
  0xe9   :  { %v424_v23 = vmax.f32 %v323_v18, 0.0  ;;  %v246_v25 = vadd.f32 %v1134_v7, %v245_v21 }
  0xeb   :  { %284 = vmatmul.bf16.gmra.mxu0 %v128_v19  ;;  %364 = vmatmul.bf16.gmra.mxu2 %v144_v20  ;;  %v468_v24 = vpack.c.bf16 %v424_v23, %v423_v22  ;;  %v393_v28 = vmax.f32 %v246_v25, 0.0 }
  0xed   :  { %652 = vmatmul.bf16.gmra.mxu3 %v468_v24 }
  0xee   :  { %v325_v26 = vpop.f32.mrf.mxu2 }
  0xef   :  { %v326_v35 = vadd.f32 %v1134_v7, %v325_v26 }
  0xf0   :  { %v247_v27 = vpop.f32.mrf.mxu0 }
  0xf1   :  { %v248_v29 = vadd.f32 %v1134_v7, %v247_v27  ;;  %v425_v42 = vmax.f32 %v326_v35, 0.0 }
  0xf3   :  { %v394_v30 = vmax.f32 %v248_v29, 0.0 }
  0xf5   :  { %v453_v36 = vpack.c.bf16 %v394_v30, %v393_v28 }
  0xf6   :  { %v327_v37 = vpop.f32.mrf.mxu2 }
  0xf7   :  { %v328_v38 = vadd.f32 %v1134_v7, %v327_v37  ;;  %577 = vmatmul.bf16.gmra.mxu1 %v453_v36 }
  0xf8   :  { %v250_v41 = vpop.f32.mrf.mxu0 }
  0xf9   :  { %v426_v43 = vmax.f32 %v328_v38, 0.0  ;;  %v251_v45 = vadd.f32 %v1134_v7, %v250_v41  ;;  %v930_v41 = vld [vmem:[%s1297_s4] ss:$0 sm:$0xff] }
  0xfb   :  { %289 = vmatmul.bf16.gmra.mxu0 %v129_v39  ;;  %369 = vmatmul.bf16.gmra.mxu2 %v145_v40  ;;  %v469_v44 = vpack.c.bf16 %v426_v43, %v425_v42  ;;  %v395_v48 = vmax.f32 %v251_v45, 0.0 }
  0xfd   :  { %657 = vmatmul.bf16.gmra.mxu3 %v469_v44 }
  0xfe   :  { %v330_v46 = vpop.f32.mrf.mxu2 }
  0xff   :  { %v331_v55 = vadd.f32 %v1134_v7, %v330_v46 }
 0x100   :  { %v252_v47 = vpop.f32.mrf.mxu0 }
 0x101   :  { %v253_v49 = vadd.f32 %v1134_v7, %v252_v47  ;;  %v427_v62 = vmax.f32 %v331_v55, 0.0 }
 0x103   :  { %v396_v50 = vmax.f32 %v253_v49, 0.0 }
 0x105   :  { %v454_v56 = vpack.c.bf16 %v396_v50, %v395_v48 }
 0x106   :  { %v332_v57 = vpop.f32.mrf.mxu2 }
 0x107   :  { %v333_v58 = vadd.f32 %v1134_v7, %v332_v57  ;;  %582 = vmatmul.bf16.gmra.mxu1 %v454_v56 }
 0x108   :  { %v255_v61 = vpop.f32.mrf.mxu0 }
 0x109   :  { %v428_v63 = vmax.f32 %v333_v58, 0.0  ;;  %v256_v1 = vadd.f32 %v1134_v7, %v255_v61 }
 0x10b   :  { %294 = vmatmul.bf16.gmra.mxu0 %v130_v59  ;;  %374 = vmatmul.bf16.gmra.mxu2 %v146_v60  ;;  %v470_v0 = vpack.c.bf16 %v428_v63, %v427_v62  ;;  %v397_v4 = vmax.f32 %v256_v1, 0.0 }
 0x10d   :  { %662 = vmatmul.bf16.gmra.mxu3 %v470_v0 }
 0x10e   :  { %v335_v2 = vpop.f32.mrf.mxu2 }
 0x10f   :  { %v336_v12 = vadd.f32 %v1134_v7, %v335_v2 }
 0x110   :  { %v257_v3 = vpop.f32.mrf.mxu0 }
 0x111   :  { %v258_v5 = vadd.f32 %v1134_v7, %v257_v3  ;;  %v429_v19 = vmax.f32 %v336_v12, 0.0 }
 0x113   :  { %v398_v6 = vmax.f32 %v258_v5, 0.0 }
 0x115   :  { %v455_v13 = vpack.c.bf16 %v398_v6, %v397_v4 }
 0x116   :  { %v337_v14 = vpop.f32.mrf.mxu2 }
 0x117   :  { %v338_v15 = vadd.f32 %v1134_v7, %v337_v14  ;;  %587 = vmatmul.bf16.gmra.mxu1 %v455_v13 }
 0x118   :  { %v260_v18 = vpop.f32.mrf.mxu0 }
 0x119   :  { %v430_v20 = vmax.f32 %v338_v15, 0.0  ;;  %v261_v22 = vadd.f32 %v1134_v7, %v260_v18 }
 0x11b   :  { %299 = vmatmul.bf16.gmra.mxu0 %v131_v16  ;;  %379 = vmatmul.bf16.gmra.mxu2 %v147_v17  ;;  %v471_v21 = vpack.c.bf16 %v430_v20, %v429_v19  ;;  %v399_v25 = vmax.f32 %v261_v22, 0.0 }
 0x11d   :  { %667 = vmatmul.bf16.gmra.mxu3 %v471_v21 }
 0x11e   :  { %v340_v23 = vpop.f32.mrf.mxu2 }
 0x11f   :  { %v341_v28 = vadd.f32 %v1134_v7, %v340_v23 }
 0x120   :  { %v262_v24 = vpop.f32.mrf.mxu0 }
 0x121   :  { %v263_v26 = vadd.f32 %v1134_v7, %v262_v24  ;;  %v431_v33 = vmax.f32 %v341_v28, 0.0 }
 0x123   :  { %v400_v27 = vmax.f32 %v263_v26, 0.0 }
 0x125   :  { %v456_v29 = vpack.c.bf16 %v400_v27, %v399_v25 }
 0x126   :  { %v342_v30 = vpop.f32.mrf.mxu2 }
 0x127   :  { %v343_v31 = vadd.f32 %v1134_v7, %v342_v30  ;;  %592 = vmatmul.bf16.gmra.mxu1 %v456_v29 }
 0x128   :  { %v265_v32 = vpop.f32.mrf.mxu0 }
 0x129   :  { %v432_v34 = vmax.f32 %v343_v31, 0.0  ;;  %v266_v36 = vadd.f32 %v1134_v7, %v265_v32 }
 0x12b   :  { %v472_v35 = vpack.c.bf16 %v432_v34, %v431_v33  ;;  %v401_v39 = vmax.f32 %v266_v36, 0.0 }
 0x12d   :  { %672 = vmatmul.bf16.gmra.mxu3 %v472_v35 }
 0x12e   :  { %v345_v37 = vpop.f32.mrf.mxu2 }
 0x12f   :  { %v346_v44 = vadd.f32 %v1134_v7, %v345_v37 }
 0x130   :  { %v267_v38 = vpop.f32.mrf.mxu0 }
 0x131   :  { %v268_v40 = vadd.f32 %v1134_v7, %v267_v38  ;;  %v433_v50 = vmax.f32 %v346_v44, 0.0 }
 0x133   :  { %v402_v42 = vmax.f32 %v268_v40, 0.0 }
 0x134   :  { %v558_v43 = vpop.f32.mrf.mxu1 }
 0x135   :  { %v559_v45 = vadd.f32 %v930_v41, %v558_v43  ;;  %v457_v46 = vpack.c.bf16 %v402_v42, %v401_v39 }
 0x136   :  { %v347_v47 = vpop.f32.mrf.mxu2 }
 0x137   :  { %815 = vst [vmem:[%s1298_s5] sm:$0xff] %v559_v45  ;;  %v348_v48 = vadd.f32 %v1134_v7, %v347_v47  ;;  %597 = vmatmul.bf16.gmra.mxu1 %v457_v46 }
 0x138   :  { %v270_v49 = vpop.f32.mrf.mxu0 }
 0x139   :  { %v434_v51 = vmax.f32 %v348_v48, 0.0  ;;  %v271_v54 = vadd.f32 %v1134_v7, %v270_v49 }
 0x13b   :  { %v473_v52 = vpack.c.bf16 %v434_v51, %v433_v50  ;;  %v403_v59 = vmax.f32 %v271_v54, 0.0 }
 0x13c   :  { %v560_v53 = vpop.f32.mrf.mxu1 }
 0x13d   :  { %v561_v55 = vadd.f32 %v930_v41, %v560_v53  ;;  %677 = vmatmul.bf16.gmra.mxu3 %v473_v52 }
 0x13e   :  { %v350_v56 = vpop.f32.mrf.mxu2 }
 0x13f   :  { %817 = vst [vmem:[%s1298_s5 + $0x8] sm:$0xff] %v561_v55  ;;  %v351_v63 = vadd.f32 %v1134_v7, %v350_v56 }
 0x140   :  { %v272_v57 = vpop.f32.mrf.mxu0  ;;  %v638_v58 = vpop.f32.mrf.mxu3 }
 0x141   :  { %v273_v60 = vadd.f32 %v1134_v7, %v272_v57  ;;  %v435_v5 = vmax.f32 %v351_v63, 0.0 }
 0x143   :  { %v404_v61 = vmax.f32 %v273_v60, 0.0 }
 0x144   :  { %v563_v62 = vpop.f32.mrf.mxu1 }
 0x145   :  { %v458_v0 = vpack.c.bf16 %v404_v61, %v403_v59 }
 0x146   :  { %v352_v1 = vpop.f32.mrf.mxu2 }
 0x147   :  { %v353_v2 = vadd.f32 %v1134_v7, %v352_v1  ;;  %602 = vmatmul.bf16.gmra.mxu1 %v458_v0 }
 0x148   :  { %v275_v3 = vpop.f32.mrf.mxu0  ;;  %v640_v4 = vpop.f32.mrf.mxu3 }
 0x149   :  { %v436_v6 = vmax.f32 %v353_v2, 0.0  ;;  %v276_v10 = vadd.f32 %v1134_v7, %v275_v3 }
 0x14b   :  { %v474_v8 = vpack.c.bf16 %v436_v6, %v435_v5  ;;  %v405_v14 = vmax.f32 %v276_v10, 0.0 }
 0x14c   :  { %v565_v9 = vpop.f32.mrf.mxu1 }
 0x14d   :  { %682 = vmatmul.bf16.gmra.mxu3 %v474_v8 }
 0x14e   :  { %v355_v11 = vpop.f32.mrf.mxu2 }
 0x14f   :  { %v356_v18 = vadd.f32 %v1134_v7, %v355_v11 }
 0x150   :  { %v277_v12 = vpop.f32.mrf.mxu0  ;;  %v643_v13 = vpop.f32.mrf.mxu3 }
 0x151   :  { %v278_v15 = vadd.f32 %v1134_v7, %v277_v12  ;;  %v437_v24 = vmax.f32 %v356_v18, 0.0 }
 0x153   :  { %v406_v16 = vmax.f32 %v278_v15, 0.0 }
 0x154   :  { %v568_v17 = vpop.f32.mrf.mxu1 }
 0x155   :  { %v459_v19 = vpack.c.bf16 %v406_v16, %v405_v14 }
 0x156   :  { %v357_v20 = vpop.f32.mrf.mxu2 }
 0x157   :  { %v358_v21 = vadd.f32 %v1134_v7, %v357_v20  ;;  %607 = vmatmul.bf16.gmra.mxu1 %v459_v19 }
 0x158   :  { %v280_v22 = vpop.f32.mrf.mxu0  ;;  %v645_v23 = vpop.f32.mrf.mxu3 }
 0x159   :  { %v438_v25 = vmax.f32 %v358_v21, 0.0  ;;  %v281_v28 = vadd.f32 %v1134_v7, %v280_v22 }
 0x15b   :  { %v475_v26 = vpack.c.bf16 %v438_v25, %v437_v24  ;;  %v407_v32 = vmax.f32 %v281_v28, 0.0 }
 0x15c   :  { %v570_v27 = vpop.f32.mrf.mxu1 }
 0x15d   :  { %687 = vmatmul.bf16.gmra.mxu3 %v475_v26 }
 0x15e   :  { %v360_v29 = vpop.f32.mrf.mxu2 }
 0x15f   :  { %v361_v36 = vadd.f32 %v1134_v7, %v360_v29 }
 0x160   :  { %v282_v30 = vpop.f32.mrf.mxu0  ;;  %v648_v31 = vpop.f32.mrf.mxu3 }
 0x161   :  { %v283_v33 = vadd.f32 %v1134_v7, %v282_v30  ;;  %v439_v42 = vmax.f32 %v361_v36, 0.0 }
 0x163   :  { %v408_v34 = vmax.f32 %v283_v33, 0.0 }
 0x164   :  { %v573_v35 = vpop.f32.mrf.mxu1 }
 0x165   :  { %v460_v37 = vpack.c.bf16 %v408_v34, %v407_v32 }
 0x166   :  { %v362_v38 = vpop.f32.mrf.mxu2 }
 0x167   :  { %v363_v39 = vadd.f32 %v1134_v7, %v362_v38  ;;  %612 = vmatmul.bf16.gmra.mxu1 %v460_v37 }
 0x168   :  { %v285_v40 = vpop.f32.mrf.mxu0  ;;  %v650_v41 = vpop.f32.mrf.mxu3 }
 0x169   :  { %v440_v43 = vmax.f32 %v363_v39, 0.0  ;;  %v286_v46 = vadd.f32 %v1134_v7, %v285_v40 }
 0x16b   :  { %v476_v44 = vpack.c.bf16 %v440_v43, %v439_v42  ;;  %v409_v50 = vmax.f32 %v286_v46, 0.0 }
 0x16c   :  { %v575_v45 = vpop.f32.mrf.mxu1 }
 0x16d   :  { %692 = vmatmul.bf16.gmra.mxu3 %v476_v44 }
 0x16e   :  { %v365_v47 = vpop.f32.mrf.mxu2 }
 0x16f   :  { %v366_v54 = vadd.f32 %v1134_v7, %v365_v47 }
 0x170   :  { %v287_v48 = vpop.f32.mrf.mxu0  ;;  %v653_v49 = vpop.f32.mrf.mxu3 }
 0x171   :  { %v288_v51 = vadd.f32 %v1134_v7, %v287_v48  ;;  %v441_v60 = vmax.f32 %v366_v54, 0.0 }
 0x173   :  { %v410_v52 = vmax.f32 %v288_v51, 0.0 }
 0x174   :  { %v578_v53 = vpop.f32.mrf.mxu1 }
 0x175   :  { %v461_v55 = vpack.c.bf16 %v410_v52, %v409_v50 }
 0x176   :  { %v367_v56 = vpop.f32.mrf.mxu2 }
 0x177   :  { %v368_v57 = vadd.f32 %v1134_v7, %v367_v56  ;;  %617 = vmatmul.bf16.gmra.mxu1 %v461_v55 }
 0x178   :  { %v290_v58 = vpop.f32.mrf.mxu0  ;;  %v655_v59 = vpop.f32.mrf.mxu3 }
 0x179   :  { %v442_v61 = vmax.f32 %v368_v57, 0.0  ;;  %v291_v0 = vadd.f32 %v1134_v7, %v290_v58 }
 0x17b   :  { %v477_v62 = vpack.c.bf16 %v442_v61, %v441_v60  ;;  %v411_v4 = vmax.f32 %v291_v0, 0.0 }
 0x17c   :  { %v580_v63 = vpop.f32.mrf.mxu1 }
 0x17d   :  { %697 = vmatmul.bf16.gmra.mxu3 %v477_v62 }
 0x17e   :  { %v370_v1 = vpop.f32.mrf.mxu2 }
 0x17f   :  { %v371_v9 = vadd.f32 %v1134_v7, %v370_v1 }
 0x180   :  { %v292_v2 = vpop.f32.mrf.mxu0  ;;  %v658_v3 = vpop.f32.mrf.mxu3 }
 0x181   :  { %v293_v5 = vadd.f32 %v1134_v7, %v292_v2  ;;  %v443_v15 = vmax.f32 %v371_v9, 0.0 }
 0x183   :  { %v412_v6 = vmax.f32 %v293_v5, 0.0 }
 0x184   :  { %v583_v8 = vpop.f32.mrf.mxu1 }
 0x185   :  { %v462_v10 = vpack.c.bf16 %v412_v6, %v411_v4 }
 0x186   :  { %v372_v11 = vpop.f32.mrf.mxu2 }
 0x187   :  { %v373_v12 = vadd.f32 %v1134_v7, %v372_v11  ;;  %622 = vmatmul.bf16.gmra.mxu1 %v462_v10 }
 0x188   :  { %v295_v13 = vpop.f32.mrf.mxu0  ;;  %v660_v14 = vpop.f32.mrf.mxu3 }
 0x189   :  { %v444_v16 = vmax.f32 %v373_v12, 0.0  ;;  %v296_v19 = vadd.f32 %v1134_v7, %v295_v13 }
 0x18b   :  { %v478_v17 = vpack.c.bf16 %v444_v16, %v443_v15  ;;  %v413_v23 = vmax.f32 %v296_v19, 0.0 }
 0x18c   :  { %v585_v18 = vpop.f32.mrf.mxu1 }
 0x18d   :  { %702 = vmatmul.bf16.gmra.mxu3 %v478_v17 }
 0x18e   :  { %v375_v20 = vpop.f32.mrf.mxu2 }
 0x18f   :  { %v376_v27 = vadd.f32 %v1134_v7, %v375_v20 }
 0x190   :  { %v297_v21 = vpop.f32.mrf.mxu0  ;;  %v663_v22 = vpop.f32.mrf.mxu3 }
 0x191   :  { %v298_v24 = vadd.f32 %v1134_v7, %v297_v21  ;;  %v445_v33 = vmax.f32 %v376_v27, 0.0 }
 0x193   :  { %v414_v25 = vmax.f32 %v298_v24, 0.0 }
 0x194   :  { %v588_v26 = vpop.f32.mrf.mxu1 }
 0x195   :  { %v463_v28 = vpack.c.bf16 %v414_v25, %v413_v23 }
 0x196   :  { %v377_v29 = vpop.f32.mrf.mxu2 }
 0x197   :  { %v378_v30 = vadd.f32 %v1134_v7, %v377_v29  ;;  %627 = vmatmul.bf16.gmra.mxu1 %v463_v28 }
 0x198   :  { %v300_v31 = vpop.f32.mrf.mxu0  ;;  %v665_v32 = vpop.f32.mrf.mxu3 }
 0x199   :  { %v446_v34 = vmax.f32 %v378_v30, 0.0  ;;  %v301_v37 = vadd.f32 %v1134_v7, %v300_v31 }
 0x19b   :  { %v479_v35 = vpack.c.bf16 %v446_v34, %v445_v33  ;;  %v415_v41 = vmax.f32 %v301_v37, 0.0 }
 0x19c   :  { %v590_v36 = vpop.f32.mrf.mxu1 }
 0x19d   :  { %707 = vmatmul.bf16.gmra.mxu3 %v479_v35 }
 0x19e   :  { %v380_v38 = vpop.f32.mrf.mxu2 }
 0x19f   :  { %v381_v45 = vadd.f32 %v1134_v7, %v380_v38 }
 0x1a0   :  { %v302_v39 = vpop.f32.mrf.mxu0  ;;  %v668_v40 = vpop.f32.mrf.mxu3 }
 0x1a1   :  { %v303_v42 = vadd.f32 %v1134_v7, %v302_v39  ;;  %v447_v50 = vmax.f32 %v381_v45, 0.0 }
 0x1a3   :  { %v416_v43 = vmax.f32 %v303_v42, 0.0 }
 0x1a4   :  { %v593_v44 = vpop.f32.mrf.mxu1 }
 0x1a5   :  { %v464_v46 = vpack.c.bf16 %v416_v43, %v415_v41 }
 0x1a6   :  { %v382_v47 = vpop.f32.mrf.mxu2 }
 0x1a7   :  { %v383_v48 = vadd.f32 %v1134_v7, %v382_v47  ;;  %632 = vmatmul.bf16.gmra.mxu1 %v464_v46 }
 0x1a8   :  { %v670_v49 = vpop.f32.mrf.mxu3 }
 0x1a9   :  { %v448_v51 = vmax.f32 %v383_v48, 0.0 }
 0x1ab   :  { %v480_v52 = vpack.c.bf16 %v448_v51, %v447_v50 }
 0x1ac   :  { %v595_v53 = vpop.f32.mrf.mxu1 }
 0x1ad   :  { %712 = vmatmul.bf16.gmra.mxu3 %v480_v52 }
 0x1b0   :  { %v673_v54 = vpop.f32.mrf.mxu3 }
 0x1b4   :  { %v598_v55 = vpop.f32.mrf.mxu1 }
 0x1b8   :  { %v675_v56 = vpop.f32.mrf.mxu3 }
 0x1bc   :  { %v600_v57 = vpop.f32.mrf.mxu1 }
 0x1c0   :  { %v678_v58 = vpop.f32.mrf.mxu3 }
 0x1c4   :  { %v603_v59 = vpop.f32.mrf.mxu1 }
 0x1c8   :  { %v680_v60 = vpop.f32.mrf.mxu3 }
 0x1cc   :  { %v605_v61 = vpop.f32.mrf.mxu1 }
 0x1d0   :  { %v683_v62 = vpop.f32.mrf.mxu3 }
 0x1d4   :  { %v608_v63 = vpop.f32.mrf.mxu1 }
 0x1d8   :  { %v685_v0 = vpop.f32.mrf.mxu3 }
 0x1dc   :  { %v610_v1 = vpop.f32.mrf.mxu1 }
 0x1e0   :  { %v688_v7 = vpop.f32.mrf.mxu3 }
 0x1e4   :  { %v613_v2 = vpop.f32.mrf.mxu1 }
 0x1e8   :  { %v690_v3 = vpop.f32.mrf.mxu3 }
 0x1ec   :  { %v615_v4 = vpop.f32.mrf.mxu1 }
 0x1f0   :  { %v693_v5 = vpop.f32.mrf.mxu3 }
 0x1f4   :  { %v618_v6 = vpop.f32.mrf.mxu1 }
 0x1f8   :  { %v695_v8 = vpop.f32.mrf.mxu3 }
 0x1fc   :  { %v620_v9 = vpop.f32.mrf.mxu1 }
 0x200   :  { %v698_v10 = vpop.f32.mrf.mxu3 }
 0x204   :  { %v623_v11 = vpop.f32.mrf.mxu1 }
 0x208   :  { %v700_v12 = vpop.f32.mrf.mxu3 }
 0x20c   :  { %v625_v13 = vpop.f32.mrf.mxu1 }
 0x210   :  { %v703_v14 = vpop.f32.mrf.mxu3 }
 0x214   :  { %v628_v15 = vpop.f32.mrf.mxu1 }
 0x218   :  { %v705_v16 = vpop.f32.mrf.mxu3 }
 0x21c   :  { %v630_v17 = vpop.f32.mrf.mxu1 }
 0x220   :  { %v708_v18 = vpop.f32.mrf.mxu3 }
 0x224   :  { %v633_v19 = vpop.f32.mrf.mxu1 }
 0x228   :  { %v710_v20 = vpop.f32.mrf.mxu3 }
 0x22c   :  { %v635_v21 = vpop.f32.mrf.mxu1 }
 0x230   :  { %v713_v22 = vpop.f32.mrf.mxu3 }
 0x238   :  { %v715_v23 = vpop.f32.mrf.mxu3 }
 0x239   :  { %823 = vsyncpa [#allocation3], 1 }
 0x23a   :  { %824 = vsyncpa [#allocation5], 1 }

</bundles_post_ra>
